<compile_context>
chip_gen: v5e
topology: v5e:2x2
jax: 0.10.0
libtpu: 0.0.40
codegen_flags: <defaults>
</compile_context>

<pallas_src>
import functools

import jax
import jax.numpy as jnp
from jax.experimental import pallas as pl
from jax.experimental.pallas import tpu as pltpu

_COORD_LANES = 8                       # [pos_x, pos_y, 1, 0, 0, 0, 0, 0]
_VMEM_TILE_BUDGET = 32 * 1024 * 1024   # budget for tiles + f32 temporaries
_VMEM_LIMIT = 48 * 1024 * 1024         # <= v7x's 64 MiB physical VMEM
_MAX_TILE_BC = 1024


def _round_up(a, b):
    return ((a + b - 1) // b) * b


def _make_kernel(hw_valid, hw_block):
    """Kernel specialized on the (static) real vs lane-padded spatial size."""
    need_lane_mask = hw_valid != hw_block

    def kernel(temp_ref, x_ref, coords_ref, out_ref):
        # temp_ref   : SMEM (1,)                 -- temperature scalar
        # x_ref      : VMEM (tile_bc, hw_block)  -- flattened heatmaps
        # coords_ref : VMEM (hw_block, 8)        -- [x, y, 1, 0...] per position
        # out_ref    : VMEM (tile_bc, 8)         -- [E[x], E[y], 1, 0...]
        t = temp_ref[0]
        z = x_ref[...].astype(jnp.float32) * t
        if need_lane_mask:
            # Padded lanes hold undefined data (partial block read); mask AFTER
            # the temperature multiply so the sign of t cannot flip the pad.
            lane = jax.lax.broadcasted_iota(jnp.int32, z.shape, 1)
            z = jnp.where(lane < hw_valid, z, -jnp.inf)

        # Numerically stable exp; the shared per-row max cancels in the ratio.
        m = jnp.max(z, axis=-1, keepdims=True)
        e = jnp.exp(z - m)

        # One MXU matmul gives [sum(e*x), sum(e*y), sum(e), 0...] per heatmap,
        # replacing the full-slab divide, two coordinate multiplies and two of
        # the three cross-lane reductions of the naive formulation.
        r = jnp.dot(e, coords_ref[...], preferred_element_type=jnp.float32)
        inv = pl.reciprocal(r[:, 2:3], approx=False)   # exact: 1e-5 parity
        out_ref[...] = (r * inv).astype(out_ref.dtype)

    return kernel


@functools.partial(jax.jit, static_argnames=("normalized_coordinates", "eps"))
def spatial_soft_argmax2d(x, temperature=1.0, normalized_coordinates=True,
                          eps=1e-8):
    # NOTE: `eps` is accepted for API parity with kornia but unused there too.
    del eps
    B, C, H, W = x.shape
    BC, HW = B * C, H * W

    itemsize = jnp.dtype(x.dtype).itemsize
    sub = max(8, 32 // itemsize)        # sublane packing: f32->8, bf16->16, i8->32
    HW_pad = _round_up(HW, 128)         # lane-aligned block width

    if BC <= sub:
        tile_bc = BC                    # block == full row extent (always legal)
    else:
        # Per-row VMEM bytes: 2x double-buffered input tile + ~3x f32
        # temporaries (z, e, cast/staging).  This keeps v7x (64 MiB) happy.
        bytes_per_row = HW_pad * (2 * itemsize + 3 * 4)
        tile_bc = int(_VMEM_TILE_BUDGET // bytes_per_row)
        tile_bc = max(sub, min(_MAX_TILE_BC, (tile_bc // sub) * sub))
        # Guarantee >=2 grid steps so the "parallel" axis can shard across
        # v7x's two TensorCores (no effect on v5e/v6e, 1 TC).
        tile_bc = min(tile_bc, _round_up(-(-BC // 2), sub))
    # TODO(synk): for extremely large H*W (>~512*512) chunk the lane axis inside
    # the kernel (running max + matmul accumulation) to bound the f32 temps.

    # Coordinate table, matching kornia.create_meshgrid flattening (row-major
    # over (h, w)): col 0 = x (varies along W), col 1 = y, col 2 = 1.
    if normalized_coordinates:
        xs = jnp.linspace(-1.0, 1.0, W, dtype=jnp.float32)
        ys = jnp.linspace(-1.0, 1.0, H, dtype=jnp.float32)
    else:
        xs = jnp.linspace(0.0, W - 1, W, dtype=jnp.float32)
        ys = jnp.linspace(0.0, H - 1, H, dtype=jnp.float32)
    pos_x = jnp.tile(xs, (H,))                       # [x0..xW-1, x0..xW-1, ...]
    pos_y = jnp.repeat(ys, W)                        # [y0 x W, y1 x W, ...]
    ones = jnp.ones((HW,), jnp.float32)
    coords = jnp.stack([pos_x, pos_y, ones], axis=-1)            # (HW, 3)
    coords = jnp.pad(coords, ((0, HW_pad - HW), (0, _COORD_LANES - 3)))

    x_flat = x.reshape(BC, HW)                       # pure view, no HBM copy
    temp = jnp.asarray(temperature, dtype=jnp.float32).reshape((1,))

    out = pl.pallas_call(
        _make_kernel(HW, HW_pad),
        out_shape=jax.ShapeDtypeStruct((BC, _COORD_LANES), x.dtype),
        grid=(pl.cdiv(BC, tile_bc),),
        in_specs=[
            pl.BlockSpec(memory_space=pltpu.MemorySpace.SMEM),       # temperature
            pl.BlockSpec((tile_bc, HW_pad), lambda i: (i, 0)),       # heatmaps
            pl.BlockSpec((HW_pad, _COORD_LANES), lambda i: (0, 0)),  # coords (resident)
        ],
        out_specs=pl.BlockSpec((tile_bc, _COORD_LANES), lambda i: (i, 0)),
        compiler_params=pltpu.CompilerParams(
            dimension_semantics=("parallel",),       # rows fully independent
            vmem_limit_bytes=_VMEM_LIMIT,
        ),
    )(temp, x_flat, coords)

    return out[:, :2].reshape(B, C, 2)


def _reference(x, temperature=1.0, normalized_coordinates=True):
    B, C, H, W = x.shape
    if normalized_coordinates:
        xs = jnp.linspace(-1.0, 1.0, W, dtype=jnp.float32)
        ys = jnp.linspace(-1.0, 1.0, H, dtype=jnp.float32)
    else:
        xs = jnp.linspace(0.0, W - 1, W, dtype=jnp.float32)
        ys = jnp.linspace(0.0, H - 1, H, dtype=jnp.float32)
    pos_x = jnp.tile(xs, (H,))
    pos_y = jnp.repeat(ys, W)
    z = x.reshape(B, C, -1).astype(jnp.float32) * temperature
    soft = jax.nn.softmax(z, axis=-1)
    ex = jnp.sum(pos_x * soft, axis=-1, keepdims=True)
    ey = jnp.sum(pos_y * soft, axis=-1, keepdims=True)
    return jnp.concatenate([ex, ey], axis=-1).astype(x.dtype)


if __name__ == "__main__":
    key = jax.random.PRNGKey(0)

    # 1) Lane-aligned HW (16*16 = 256), single row tile.
    B, C, H, W = 2, 4, 16, 16
    x = jax.random.normal(key, (B, C, H, W), dtype=jnp.float32) * 5.0
    out = jax.block_until_ready(
        spatial_soft_argmax2d(x, temperature=1.0, normalized_coordinates=True))
    ref = _reference(x, temperature=1.0, normalized_coordinates=True)
    assert out.shape == (B, C, 2), out.shape
    assert jnp.allclose(out, ref, atol=1e-5, rtol=1e-5), (
        float(jnp.max(jnp.abs(out - ref))))

    # 2) Non-lane-aligned HW (13*13 = 169) + BC < sublane multiple; exercises
    #    the in-kernel lane mask and unnormalized coordinates.
    x2 = jax.random.normal(jax.random.PRNGKey(1), (1, 3, 13, 13),
                           dtype=jnp.float32) * 3.0
    out2 = jax.block_until_ready(
        spatial_soft_argmax2d(x2, temperature=0.5,
                              normalized_coordinates=False))
    ref2 = _reference(x2, temperature=0.5, normalized_coordinates=False)
    assert out2.shape == (1, 3, 2), out2.shape
    assert jnp.allclose(out2, ref2, atol=1e-4, rtol=1e-5), (
        float(jnp.max(jnp.abs(out2 - ref2))))

    # 3) Multi-step grid with a partial last row tile (BC=20, tile_bc=16).
    x3 = jax.random.normal(jax.random.PRNGKey(2), (4, 5, 32, 32),
                           dtype=jnp.float32) * 4.0
    out3 = jax.block_until_ready(
        spatial_soft_argmax2d(x3, temperature=1.0,
                              normalized_coordinates=True))
    ref3 = _reference(x3, temperature=1.0, normalized_coordinates=True)
    assert out3.shape == (4, 5, 2), out3.shape
    assert jnp.allclose(out3, ref3, atol=1e-4, rtol=1e-5), (
        float(jnp.max(jnp.abs(out3 - ref3))))

    print("KERNEL_OK")
</pallas_src>

<mosaic_0001>
module attributes {stable_mosaic.version = 11 : i64} {
  func.func @kernel(%arg0: i32, %arg1: memref<1xf32, #tpu.memory_space<smem>>, %arg2: memref<8x256xf32, #tpu.memory_space<vmem>>, %arg3: memref<256x8xf32, #tpu.memory_space<vmem>>, %arg4: memref<8x8xf32, #tpu.memory_space<vmem>>) attributes {dimension_semantics = [#tpu.dimension_semantics<parallel>], iteration_bounds = array<i64: 1>, scalar_prefetch = 0 : i64, scratch_operands = 0 : i64, tpu.core_type = #tpu.core_type<tc>, window_params = [{transform_indices = @transform_0, window_bounds = array<i64: 1>}, {transform_indices = @transform_1, window_bounds = array<i64: 8, 256>}, {pipeline_mode = #tpu.pipeline_mode<synchronous>, transform_indices = @transform_2, window_bounds = array<i64: 256, 8>}, {transform_indices = @transform_3, window_bounds = array<i64: 8, 8>}]} {
    %c0 = arith.constant 0 : index
    %0 = memref.load %arg1[%c0] : memref<1xf32, #tpu.memory_space<smem>>
    %c0_0 = arith.constant 0 : index
    %c0_1 = arith.constant 0 : index
    %1 = vector.load %arg2[%c0_0, %c0_1] : memref<8x256xf32, #tpu.memory_space<vmem>>, vector<8x256xf32>
    %2 = vector.broadcast %0 : f32 to vector<8x256xf32>
    %3 = arith.mulf %1, %2 : vector<8x256xf32>
    %cst = arith.constant dense<0xFF800000> : vector<8xf32>
    %4 = vector.multi_reduction <maximumf>, %3, %cst [1] : vector<8x256xf32> to vector<8xf32>
    %5 = vector.shape_cast %4 : vector<8xf32> to vector<8x1xf32>
    %6 = vector.broadcast %5 : vector<8x1xf32> to vector<8x256xf32>
    %7 = arith.subf %3, %6 : vector<8x256xf32>
    %8 = math.exp %7 : vector<8x256xf32>
    %c0_2 = arith.constant 0 : index
    %c0_3 = arith.constant 0 : index
    %9 = vector.load %arg3[%c0_2, %c0_3] : memref<256x8xf32, #tpu.memory_space<vmem>>, vector<256x8xf32>
    %cst_4 = arith.constant dense<0.000000e+00> : vector<8x8xf32>
    %10 = tpu.matmul %8, %9, %cst_4 {dimension_numbers = #tpu.dot_dimension_numbers<[1], [0], [0], [1], [0, 0, 1, 1], [], []>} : vector<8x256xf32>, vector<256x8xf32>, vector<8x8xf32> -> vector<8x8xf32>
    %11 = vector.extract_strided_slice %10 {offsets = [0, 2], sizes = [8, 1], strides = [1, 1]} : vector<8x8xf32> to vector<8x1xf32>
    %12 = tpu.reciprocal %11 : vector<8x1xf32> -> vector<8x1xf32>
    %13 = vector.broadcast %12 : vector<8x1xf32> to vector<8x8xf32>
    %14 = arith.mulf %10, %13 : vector<8x8xf32>
    %c0_5 = arith.constant 0 : index
    %c0_6 = arith.constant 0 : index
    %15 = vector.load %arg4[%c0_5, %c0_6] : memref<8x8xf32, #tpu.memory_space<vmem>>, vector<8x8xf32>
    tpu.vector_store %arg4[%c0_5, %c0_6], %14 {strides = array<i32>} : memref<8x8xf32, #tpu.memory_space<vmem>>, vector<8x8xf32>,
    return
  }
  func.func @transform_0(%arg0: i32) -> i32 {
    %c0_i32 = arith.constant 0 : i32
    %c0_i32_0 = arith.constant 0 : i32
    return %c0_i32 : i32
  }
  func.func @transform_1(%arg0: i32) -> (i32, i32) {
    %c0_i32 = arith.constant 0 : i32
    %c0_i32_0 = arith.constant 0 : i32
    return %arg0, %c0_i32 : i32, i32
  }
  func.func @transform_2(%arg0: i32) -> (i32, i32) {
    %c0_i32 = arith.constant 0 : i32
    %c0_i32_0 = arith.constant 0 : i32
    %c0_i32_1 = arith.constant 0 : i32
    return %c0_i32, %c0_i32_0 : i32, i32
  }
  func.func @transform_3(%arg0: i32) -> (i32, i32) {
    %c0_i32 = arith.constant 0 : i32
    %c0_i32_0 = arith.constant 0 : i32
    return %arg0, %c0_i32 : i32, i32
  }
}

</mosaic_0001>

<bundles_post_ra>
// kernel: tile.8
= control target key start
LH: loop header
LB: loop body
LE: loop exit
PB: predicated region body
PF: predicated region fallthrough
CT: control target
= control target key end

     0   :  { %s28_s0 = inlined_call_operand.vmem [shape: f32[16], index: 0, kind: input, shape index: {}]   ;;  %s29_s1 = inlined_call_operand.vmem [shape: f32[16,16], index: 1, kind: output, shape index: {}]  }
   0x1   :  { %v4_v0 = vld [vmem:[%s28_s0] ss:$0 sm:$0xff] }
   0x2   :  { %5 = vst [vmem:[%s29_s1] sm:$0xff] %v4_v0 }
   0x3   :  { %8 = vst [vmem:[%s29_s1 + $0x8] sm:$0xff] %v4_v0 }

// kernel: spatial_soft_argmax2d.1
= control target key start
LH: loop header
LB: loop body
LE: loop exit
PB: predicated region body
PF: predicated region fallthrough
CT: control target
= control target key end

     0   :  { %v136_v45 = vmov 2   ;;  %vm122_vm4 = vcmask 64512   ;;  %s273_s0 = inlined_call_operand.<no memory space> [shape: f32[1], index: 0, kind: input, shape index: {}]   ;;  %s274_s1 = inlined_call_operand.vmem [shape: f32[8,256], index: 1, kind: input, shape index: {}]   ;;  %s275_s2 = inlined_call_operand.vmem [shape: f32[256,8], index: 2, kind: input, shape index: {}]   ;;  %s276_s3 = inlined_call_operand.vmem [shape: f32[8,8], index: 3, kind: output, shape index: {}]  }
   0x1   :  { %v16_v0 = vld [vmem:[%s274_s1] sm:$0xff]  ;;  %v17_v1 = vld [vmem:[%s274_s1 + $0x8] sm:$0xff]  ;;  %v18_v2 = vstv %s273_s0  ;;  %v45_v3 = vld [vmem:[%s275_s2 + $0x78] sm:$0xff]  ;;  %129 = vset.pattern.permute.xlu0 %v136_v45 }
   0x2   :  { %v169_v4 = vmul.f32 %v18_v2, %v16_v0  ;;  %v171_v5 = vmul.f32 %v18_v2, %v17_v1  ;;  %62 = vmatpush.msra.mxu0 %v45_v3  ;;  %v61_v6 = vld [vmem:[%s275_s2 + $0xf8] sm:$0xff]  ;;  %v44_v7 = vld [vmem:[%s275_s2 + $0x70] sm:$0xff]  ;;  %v43_v9 = vld [vmem:[%s275_s2 + $0x68] sm:$0xff] }
   0x3   :  { %v60_v8 = vld [vmem:[%s275_s2 + $0xf0] sm:$0xff]  ;;  %82 = vmatpush.msra.mxu1 %v61_v6  ;;  %v59_v11 = vld [vmem:[%s275_s2 + $0xe8] sm:$0xff]  ;;  %v42_v12 = vld [vmem:[%s275_s2 + $0x60] sm:$0xff] }
   0x4   :  { %v21_v10 = vmax.f32 %v169_v4, %v171_v5  ;;  %63 = vmatpush.msra.mxu0 %v44_v7  ;;  %v58_v13 = vld [vmem:[%s275_s2 + $0xe0] sm:$0xff]  ;;  %v41_v14 = vld [vmem:[%s275_s2 + $0x58] sm:$0xff]  ;;  %v40_v16 = vld [vmem:[%s275_s2 + $0x50] sm:$0xff] }
   0x5   :  { %83 = vmatpush.msra.mxu1 %v60_v8  ;;  %v57_v15 = vld [vmem:[%s275_s2 + $0xd8] sm:$0xff]  ;;  %v56_v17 = vld [vmem:[%s275_s2 + $0xd0] sm:$0xff]  ;;  %v39_v18 = vld [vmem:[%s275_s2 + $0x48] sm:$0xff] }
   0x6   :  { %22 = vmax.xlane.f32.xlu0 %v21_v10  ;;  %64 = vmatpush.msra.mxu0 %v43_v9  ;;  %v55_v19 = vld [vmem:[%s275_s2 + $0xc8] sm:$0xff]  ;;  %v38_v20 = vld [vmem:[%s275_s2 + $0x40] sm:$0xff]  ;;  %v37_v22 = vld [vmem:[%s275_s2 + $0x38] sm:$0xff] }
   0x7   :  { %84 = vmatpush.msra.mxu1 %v59_v11  ;;  %v54_v21 = vld [vmem:[%s275_s2 + $0xc0] sm:$0xff]  ;;  %v53_v23 = vld [vmem:[%s275_s2 + $0xb8] sm:$0xff]  ;;  %v36_v24 = vld [vmem:[%s275_s2 + $0x30] sm:$0xff] }
   0x8   :  { %65 = vmatpush.msra.mxu0 %v42_v12  ;;  %v52_v25 = vld [vmem:[%s275_s2 + $0xb0] sm:$0xff]  ;;  %v35_v26 = vld [vmem:[%s275_s2 + $0x28] sm:$0xff]  ;;  %v34_v28 = vld [vmem:[%s275_s2 + $0x20] sm:$0xff] }
   0x9   :  { %85 = vmatpush.msra.mxu1 %v58_v13  ;;  %v51_v27 = vld [vmem:[%s275_s2 + $0xa8] sm:$0xff]  ;;  %v50_v29 = vld [vmem:[%s275_s2 + $0xa0] sm:$0xff]  ;;  %v33_v30 = vld [vmem:[%s275_s2 + $0x18] sm:$0xff] }
   0xa   :  { %66 = vmatpush.msra.mxu0 %v41_v14  ;;  %v49_v31 = vld [vmem:[%s275_s2 + $0x98] sm:$0xff]  ;;  %v32_v32 = vld [vmem:[%s275_s2 + $0x10] sm:$0xff]  ;;  %v31_v34 = vld [vmem:[%s275_s2 + $0x8] sm:$0xff] }
   0xb   :  { %86 = vmatpush.msra.mxu1 %v57_v15  ;;  %v48_v33 = vld [vmem:[%s275_s2 + $0x90] sm:$0xff]  ;;  %v47_v35 = vld [vmem:[%s275_s2 + $0x88] sm:$0xff]  ;;  %v30_v36 = vld [vmem:[%s275_s2] sm:$0xff] }
   0xc   :  { %67 = vmatpush.msra.mxu0 %v40_v16  ;;  %v46_v37 = vld [vmem:[%s275_s2 + $0x80] sm:$0xff] }
   0xd   :  { %87 = vmatpush.msra.mxu1 %v56_v17 }
   0xe   :  { %68 = vmatpush.msra.mxu0 %v39_v18 }
   0xf   :  { %88 = vmatpush.msra.mxu1 %v55_v19 }
  0x10   :  { %69 = vmatpush.msra.mxu0 %v38_v20 }
  0x11   :  { %89 = vmatpush.msra.mxu1 %v54_v21 }
  0x12   :  { %70 = vmatpush.msra.mxu0 %v37_v22 }
  0x13   :  { %90 = vmatpush.msra.mxu1 %v53_v23 }
  0x14   :  { %71 = vmatpush.msra.mxu0 %v36_v24 }
  0x15   :  { %91 = vmatpush.msra.mxu1 %v52_v25 }
  0x16   :  { %72 = vmatpush.msra.mxu0 %v35_v26 }
  0x17   :  { %92 = vmatpush.msra.mxu1 %v51_v27 }
  0x18   :  { %73 = vmatpush.msra.mxu0 %v34_v28 }
  0x19   :  { %93 = vmatpush.msra.mxu1 %v50_v29 }
  0x1a   :  { %74 = vmatpush.msra.mxu0 %v33_v30 }
  0x1b   :  { %94 = vmatpush.msra.mxu1 %v49_v31 }
  0x1c   :  { %75 = vmatpush.msra.mxu0 %v32_v32 }
  0x1d   :  { %95 = vmatpush.msra.mxu1 %v48_v33 }
  0x1e   :  { %76 = vmatpush.msra.mxu0 %v31_v34 }
  0x1f   :  { %96 = vmatpush.msra.mxu1 %v47_v35 }
  0x20   :  { %77 = vmatpush.msra.mxu0 %v30_v36 }
  0x21   :  { %97 = vmatpush.msra.mxu1 %v46_v37 }
  0x79   :  { %v23_v38 = vpop.xlane.xlu0 %22 }
  0x7a   :  { %v24_v39 = vsub.f32 %v169_v4, %v23_v38  ;;  %v25_v40 = vsub.f32 %v171_v5, %v23_v38 }
  0x7c   :  { %v26_v41 = vmul.f32 1.442695, %v24_v39  ;;  %v28_v42 = vmul.f32 1.442695, %v25_v40 }
  0x7e   :  { %130 = vpow2.f32 %v26_v41 }
  0x7f   :  { %132 = vpow2.f32 %v28_v42 }
  0x84   :  { %v131_v43 = vpop.eup %130 }
  0x85   :  { %v133_v44 = vpop.eup %132  ;;  %78 = vmatmul.f32.vlgmr.msra.gmra.mxu0 %v131_v43 }
  0x86   :  { %98 = vmatmul.f32.vlgmr.msra.gmra.mxu1 %v133_v44 }
 0x102   :  { %v79_v46 = vpop.f32.mrf.mxu0 }
 0x103   :  { %v99_v47 = vpop.f32.mrf.mxu1 }
 0x104   :  { %v100_v48 = vadd.f32 %v99_v47, %v79_v46 }
 0x106   :  { %134 = vrcp.f32 %v100_v48  ;;  %v113_v52 = vand.u32 2147483648, %v100_v48  ;;  %v111_v54 = vand.u32 2147483647, %v100_v48  ;;  %vm107_vm1 = vweird.f32 %v100_v48 }
 0x108   :  { %v114_v56 = vor.u32 1.1754944e-38, %v113_v52  ;;  %vm112_vm3 = vcmp.eq.f32.partialorder %v111_v54, 8.507059e+37 }
 0x10c   :  { %v135_v49 = vpop.eup %134 }
 0x10d   :  { %v103_v50 = vmul.f32 %v135_v49, %v100_v48  ;;  %vm108_vm0 = vweird.f32 %v135_v49 }
 0x10e   :  { %vm109_vm2 = vmor %vm107_vm1, %vm108_vm0 }
 0x10f   :  { %v104_v51 = vsub.f32 1.0, %v103_v50 }
 0x111   :  { %v105_v53 = vmul.f32 %v135_v49, %v104_v51 }
 0x113   :  { %v106_v55 = vadd.f32 %v135_v49, %v105_v53 }
 0x115   :  { %v110_v57 = vsel %vm109_vm2, %v135_v49, %v106_v55 }
 0x116   :  { %v115_v58 = vsel %vm112_vm3, %v114_v56, %v110_v57 }
 0x117   :  { %118 = vperm.xlu0 %129, %v115_v58  }
 0x189   :  { %v119_v59 = vpop.permute.xlu0 %118 }
 0x18a   :  { %v121_v60 = vmul.f32 %v119_v59, %v100_v48 }
 0x18c   :  { %123 = vst.msk [vmem:[%s276_s3] sm:$0xff] %vm122_vm4, %v121_v60 }

</bundles_post_ra>
